<compile_context>
chip_gen: v6e
topology: v6e:2x2x1
jax: 0.10.0
libtpu: 0.0.40
codegen_flags: <defaults>
</compile_context>

<pallas_src>
import numpy as np
import jax
import jax.numpy as jnp
from jax.experimental import pallas as pl
from jax.experimental.pallas import tpu as pltpu

# ---- shapes implied by the PyTorch module (fc1 in_features = 32*3*3
# ----  => conv output 6x6 => input spatial 8x8, 2 input channels) ----
B = 2
CIN, COUT = 2, 32
H = W = 8
K = 3
OH = OW = H - K + 1          # 6
PH = PW = OH // 2            # 3
NPOOL = PH * PW              # 9
HID = 64
NCLS = 4

GCOL = 384                   # lane-aligned width of one pool-offset column group
NCONV_COLS = 4 * GCOL        # 1536
NCONV_ROWS = CIN * H * W + 8 # 128 data rows + 1 bias row + 7 zero pad = 136
NFC_ROWS = 512               # 384 (fc1 block, incl. bias row 288) + 128 (fc2 block)


def _build_conv_widx():
    """Static gather map: packed conv params -> [136, 1536] conv weight slab."""
    n_wc = COUT * CIN * K * K            # 576
    bias_off = n_wc                      # bc[c] lives at 576 + c
    one_idx = n_wc + COUT                # 608 -> constant 1.0
    zero_idx = one_idx + 1               # 609 -> constant 0.0
    idx = np.full((NCONV_ROWS, NCONV_COLS), zero_idx, dtype=np.int32)
    bias_row = CIN * H * W               # 128
    for dh in range(2):
        for dw in range(2):
            d = dh * 2 + dw
            for ph in range(PH):
                for pw in range(PW):
                    j = ph * PW + pw
                    oh, ow = 2 * ph + dh, 2 * pw + dw
                    for c in range(COUT):
                        col = d * GCOL + j * COUT + c
                        for cin in range(CIN):
                            for kh in range(K):
                                for kw in range(K):
                                    r = cin * H * W + (oh + kh) * W + (ow + kw)
                                    idx[r, col] = ((c * CIN + cin) * K + kh) * K + kw
                        idx[bias_row, col] = bias_off + c            # conv bias
                    idx[bias_row, d * GCOL + COUT * NPOOL] = one_idx # const-1 col 288
    return idx


def _build_fc_widx():
    """Static gather map: packed fc params -> [512, 128] fc1+fc2 weight slab."""
    n_w1 = HID * COUT * NPOOL            # 18432
    b1_off = n_w1
    w2_off = b1_off + HID                # 18496
    b2_off = w2_off + NCLS * HID         # 18752
    one_idx = b2_off + NCLS              # 18756 -> constant 1.0
    zero_idx = one_idx + 1               # 18757 -> constant 0.0
    idx = np.full((NFC_ROWS, 128), zero_idx, dtype=np.int32)
    # fc1 block: rows 0..287 are (j, c); torch fc1 column index is c*9 + j.
    for j in range(NPOOL):
        for c in range(COUT):
            r = j * COUT + c
            for hid in range(HID):
                idx[r, hid] = hid * (COUT * NPOOL) + c * NPOOL + j
    for hid in range(HID):
        idx[COUT * NPOOL, hid] = b1_off + hid          # row 288: b1 (times const-1 act)
    idx[COUT * NPOOL, HID] = one_idx                   # row 288, col 64: feeds const-1 to fc2
    # fc2 block: rows 384..447 are w2.T, row 448 is b2.
    for n in range(NCLS):
        for hid in range(HID):
            idx[384 + hid, n] = w2_off + n * HID + hid
        idx[384 + HID, n] = b2_off + n
    return idx


_CONV_WIDX = _build_conv_widx()
_FC_WIDX = _build_fc_widx()


def cnn_kernel(x_ref, wconv_ref, wfc_ref, out_ref):
    # x_ref    : [B, 136]   (flattened NCHW image, col 128 = 1.0, rest zero pad)
    # wconv_ref: [136, 1536] conv weight slab (cols d*384 + j*32 + c; bias in row 128)
    # wfc_ref  : [512, 128]  rows 0:384 = fc1 block, rows 384:512 = fc2 block
    # out_ref  : [B, 128]    lane-dense logits (cols 0:4 real)
    conv = jnp.dot(x_ref[...], wconv_ref[...],
                   preferred_element_type=jnp.float32)            # [B, 1536]
    # MaxPool2x2 == elementwise max over the four 384-wide (128-aligned) groups;
    # ReLU once afterwards (identical to relu->pool; bias already inside conv).
    pooled = jnp.maximum(
        jnp.maximum(jnp.maximum(conv[:, 0:384], conv[:, 384:768]),
                    jnp.maximum(conv[:, 768:1152], conv[:, 1152:1536])),
        0.0)                                                       # [B, 384]
    # fc1 (+bias via constant-1 column 288) in one matmul, ReLU.
    h = jnp.maximum(jnp.dot(pooled, wfc_ref[0:384, :],
                            preferred_element_type=jnp.float32), 0.0)   # [B, 128]
    # fc2 (+bias via constant-1 column 64), lane-dense store.
    out_ref[...] = jnp.dot(h, wfc_ref[384:512, :],
                           preferred_element_type=jnp.float32)     # [B, 128]


def _prepare_weights(wc, bc, w1, b1, w2, b2):
    """Pack PyTorch-shaped params into the two weight slabs (2 gathers total)."""
    pvec_c = jnp.concatenate([wc.reshape(-1), bc,
                              jnp.ones((1,), jnp.float32),
                              jnp.zeros((1,), jnp.float32)])
    w_aug = pvec_c[_CONV_WIDX]                                     # [136, 1536]
    pvec_f = jnp.concatenate([w1.reshape(-1), b1, w2.reshape(-1), b2,
                              jnp.ones((1,), jnp.float32),
                              jnp.zeros((1,), jnp.float32)])
    wfc = pvec_f[_FC_WIDX]                                         # [512, 128]
    return w_aug, wfc


@jax.jit
def simple_cnn_forward(x, params):
    wc, bc, w1, b1, w2, b2 = params
    bsz = x.shape[0]
    w_aug, wfc = _prepare_weights(wc, bc, w1, b1, w2, b2)
    x_flat = x.reshape(bsz, CIN * H * W).astype(jnp.float32)       # (cin, h, w) order
    x_aug = jnp.concatenate([x_flat,
                             jnp.ones((bsz, 1), jnp.float32),
                             jnp.zeros((bsz, 7), jnp.float32)], axis=1)  # [B, 136]

    vmem = lambda: pl.BlockSpec(memory_space=pltpu.MemorySpace.VMEM)
    out = pl.pallas_call(
        cnn_kernel,
        out_shape=jax.ShapeDtypeStruct((bsz, 128), jnp.float32),
        in_specs=[vmem(), vmem(), vmem()],
        out_specs=vmem(),
    )(x_aug, w_aug, wfc)
    return out[:, :NCLS]


def reference_forward(x, params):
    """Pure-JAX reference mirroring the PyTorch module exactly."""
    wc, bc, w1, b1, w2, b2 = params
    y = jax.lax.conv_general_dilated(x, wc, (1, 1), 'VALID',
                                     dimension_numbers=('NCHW', 'OIHW', 'NCHW'))
    y = jnp.maximum(y + bc[None, :, None, None], 0.0)
    y = jax.lax.reduce_window(y, -jnp.inf, jax.lax.max,
                              (1, 1, 2, 2), (1, 1, 2, 2), 'VALID')
    y = y.reshape(y.shape[0], -1)            # (c, h, w) order == torch .view
    y = jnp.maximum(y @ w1.T + b1, 0.0)
    return y @ w2.T + b2


if __name__ == "__main__":
    key = jax.random.PRNGKey(0)
    ks = jax.random.split(key, 7)
    x = jax.random.normal(ks[0], (B, CIN, H, W), dtype=jnp.float32)

    # Deterministic synthetic parameters (PyTorch shapes).
    wc = 0.1 * jax.random.normal(ks[1], (COUT, CIN, K, K), dtype=jnp.float32)
    bc = 0.1 * jax.random.normal(ks[2], (COUT,), dtype=jnp.float32)
    w1 = 0.1 * jax.random.normal(ks[3], (HID, COUT * NPOOL), dtype=jnp.float32)
    b1 = 0.1 * jax.random.normal(ks[4], (HID,), dtype=jnp.float32)
    w2 = 0.1 * jax.random.normal(ks[5], (NCLS, HID), dtype=jnp.float32)
    b2 = 0.1 * jax.random.normal(ks[6], (NCLS,), dtype=jnp.float32)
    params = (wc, bc, w1, b1, w2, b2)

    out = jax.block_until_ready(simple_cnn_forward(x, params))
    ref = jax.block_until_ready(reference_forward(x, params))
    assert out.shape == (B, NCLS)
    assert jnp.allclose(out, ref, rtol=1e-4, atol=1e-4), (out, ref)
    print("KERNEL_OK")
</pallas_src>

<mosaic_0001>
module attributes {stable_mosaic.version = 11 : i64} {
  func.func @cnn_kernel(%arg0: memref<2x136xf32, #tpu.memory_space<vmem>>, %arg1: memref<136x1536xf32, #tpu.memory_space<vmem>>, %arg2: memref<512x128xf32, #tpu.memory_space<vmem>>, %arg3: memref<2x128xf32, #tpu.memory_space<vmem>>) attributes {dimension_semantics = [], scalar_prefetch = 0 : i64, scratch_operands = 0 : i64, tpu.core_type = #tpu.core_type<tc>} {
    %c0 = arith.constant 0 : index
    %c0_0 = arith.constant 0 : index
    %0 = vector.load %arg0[%c0, %c0_0] : memref<2x136xf32, #tpu.memory_space<vmem>>, vector<2x136xf32>
    %c0_1 = arith.constant 0 : index
    %c0_2 = arith.constant 0 : index
    %1 = vector.load %arg1[%c0_1, %c0_2] : memref<136x1536xf32, #tpu.memory_space<vmem>>, vector<136x1536xf32>
    %cst = arith.constant dense<0.000000e+00> : vector<2x1536xf32>
    %2 = tpu.matmul %0, %1, %cst {dimension_numbers = #tpu.dot_dimension_numbers<[1], [0], [0], [1], [0, 0, 1, 1], [], []>} : vector<2x136xf32>, vector<136x1536xf32>, vector<2x1536xf32> -> vector<2x1536xf32>
    %3 = vector.extract_strided_slice %2 {offsets = [0, 0], sizes = [2, 384], strides = [1, 1]} : vector<2x1536xf32> to vector<2x384xf32>
    %4 = vector.extract_strided_slice %2 {offsets = [0, 384], sizes = [2, 384], strides = [1, 1]} : vector<2x1536xf32> to vector<2x384xf32>
    %5 = arith.maximumf %3, %4 : vector<2x384xf32>
    %6 = vector.extract_strided_slice %2 {offsets = [0, 768], sizes = [2, 384], strides = [1, 1]} : vector<2x1536xf32> to vector<2x384xf32>
    %7 = vector.extract_strided_slice %2 {offsets = [0, 1152], sizes = [2, 384], strides = [1, 1]} : vector<2x1536xf32> to vector<2x384xf32>
    %8 = arith.maximumf %6, %7 : vector<2x384xf32>
    %9 = arith.maximumf %5, %8 : vector<2x384xf32>
    %cst_3 = arith.constant 0.000000e+00 : f32
    %10 = vector.broadcast %cst_3 : f32 to vector<2x384xf32>
    %11 = arith.maximumf %9, %10 : vector<2x384xf32>
    %c0_4 = arith.constant 0 : index
    %c0_5 = arith.constant 0 : index
    %12 = vector.load %arg2[%c0_4, %c0_5] : memref<512x128xf32, #tpu.memory_space<vmem>>, vector<384x128xf32>
    %cst_6 = arith.constant dense<0.000000e+00> : vector<2x128xf32>
    %13 = tpu.matmul %11, %12, %cst_6 {dimension_numbers = #tpu.dot_dimension_numbers<[1], [0], [0], [1], [0, 0, 1, 1], [], []>} : vector<2x384xf32>, vector<384x128xf32>, vector<2x128xf32> -> vector<2x128xf32>
    %cst_7 = arith.constant 0.000000e+00 : f32
    %14 = vector.broadcast %cst_7 : f32 to vector<2x128xf32>
    %15 = arith.maximumf %13, %14 : vector<2x128xf32>
    %c384 = arith.constant 384 : index
    %c0_8 = arith.constant 0 : index
    %16 = vector.load %arg2[%c384, %c0_8] : memref<512x128xf32, #tpu.memory_space<vmem>>, vector<128x128xf32>
    %cst_9 = arith.constant dense<0.000000e+00> : vector<2x128xf32>
    %17 = tpu.matmul %15, %16, %cst_9 {dimension_numbers = #tpu.dot_dimension_numbers<[1], [0], [0], [1], [0, 0, 1, 1], [], []>} : vector<2x128xf32>, vector<128x128xf32>, vector<2x128xf32> -> vector<2x128xf32>
    %c0_10 = arith.constant 0 : index
    %c0_11 = arith.constant 0 : index
    %18 = vector.load %arg3[%c0_10, %c0_11] : memref<2x128xf32, #tpu.memory_space<vmem>>, vector<2x128xf32>
    tpu.vector_store %arg3[%c0_10, %c0_11], %17 {strides = array<i32>} : memref<2x128xf32, #tpu.memory_space<vmem>>, vector<2x128xf32>,
    return
  }
}

</mosaic_0001>

<bundles_post_ra>
// kernel: simple_cnn_forward.1
= control target key start
LH: loop header
LB: loop body
LE: loop exit
PB: predicated region body
PF: predicated region fallthrough
CT: control target
= control target key end

     0   :  { %vm230_vm0 = vcmask 64512   ;;  %s2025_s0 = inlined_call_operand.vmem [shape: f32[2,136], index: 0, kind: input, shape index: {}]   ;;  %s2026_s1 = inlined_call_operand.vmem [shape: f32[136,1536], index: 1, kind: input, shape index: {}]   ;;  %s2027_s2 = inlined_call_operand.vmem [shape: f32[512,128], index: 2, kind: input, shape index: {}]   ;;  %s2028_s3 = inlined_call_operand.hbm [shape: f32[2,128], index: 3, kind: output, shape index: {}]  }
   0x1   :  { %v197_v0 = vld [vmem:[%s2026_s1 + $0x5a8] sm:$0xff]  ;;  %v199_v1 = vld [vmem:[%s2026_s1 + $0x5b8] sm:$0xff]  ;;  %v196_v2 = vld [vmem:[%s2026_s1 + $0x5a0] sm:$0xff] }
   0x2   :  { %233 = vmatprep.subr.mxu0 %v197_v0  ;;  %304 = vmatprep.subr.mxu1 %v199_v1  ;;  %v198_v3 = vld [vmem:[%s2026_s1 + $0x5b0] sm:$0xff]  ;;  %v185_v4 = vld [vmem:[%s2026_s1 + $0x548] sm:$0xff]  ;;  %v187_v5 = vld [vmem:[%s2026_s1 + $0x558] sm:$0xff] }
   0x3   :  { %234 = vmatpush1.msra.mxu0 %v196_v2  ;;  %305 = vmatpush1.msra.mxu1 %v198_v3  ;;  %v184_v6 = vld [vmem:[%s2026_s1 + $0x540] sm:$0xff]  ;;  %v186_v7 = vld [vmem:[%s2026_s1 + $0x550] sm:$0xff]  ;;  %v173_v8 = vld [vmem:[%s2026_s1 + $0x4e8] sm:$0xff] }
   0x4   :  { %235 = vmatprep.subr.mxu0 %v185_v4  ;;  %306 = vmatprep.subr.mxu1 %v187_v5  ;;  %v175_v9 = vld [vmem:[%s2026_s1 + $0x4f8] sm:$0xff]  ;;  %v172_v10 = vld [vmem:[%s2026_s1 + $0x4e0] sm:$0xff]  ;;  %v174_v11 = vld [vmem:[%s2026_s1 + $0x4f0] sm:$0xff] }
   0x5   :  { %236 = vmatpush1.msra.mxu0 %v184_v6  ;;  %307 = vmatpush1.msra.mxu1 %v186_v7  ;;  %v161_v12 = vld [vmem:[%s2026_s1 + $0x488] sm:$0xff]  ;;  %v163_v13 = vld [vmem:[%s2026_s1 + $0x498] sm:$0xff]  ;;  %v160_v14 = vld [vmem:[%s2026_s1 + $0x480] sm:$0xff] }
   0x6   :  { %237 = vmatprep.subr.mxu0 %v173_v8  ;;  %308 = vmatprep.subr.mxu1 %v175_v9  ;;  %v162_v15 = vld [vmem:[%s2026_s1 + $0x490] sm:$0xff]  ;;  %v149_v16 = vld [vmem:[%s2026_s1 + $0x428] sm:$0xff]  ;;  %v151_v17 = vld [vmem:[%s2026_s1 + $0x438] sm:$0xff] }
   0x7   :  { %238 = vmatpush1.msra.mxu0 %v172_v10  ;;  %309 = vmatpush1.msra.mxu1 %v174_v11  ;;  %v148_v18 = vld [vmem:[%s2026_s1 + $0x420] sm:$0xff]  ;;  %v150_v19 = vld [vmem:[%s2026_s1 + $0x430] sm:$0xff]  ;;  %v137_v20 = vld [vmem:[%s2026_s1 + $0x3c8] sm:$0xff] }
   0x8   :  { %239 = vmatprep.subr.mxu0 %v161_v12  ;;  %310 = vmatprep.subr.mxu1 %v163_v13  ;;  %v139_v21 = vld [vmem:[%s2026_s1 + $0x3d8] sm:$0xff]  ;;  %v136_v22 = vld [vmem:[%s2026_s1 + $0x3c0] sm:$0xff]  ;;  %v138_v23 = vld [vmem:[%s2026_s1 + $0x3d0] sm:$0xff] }
   0x9   :  { %240 = vmatpush1.msra.mxu0 %v160_v14  ;;  %311 = vmatpush1.msra.mxu1 %v162_v15  ;;  %v125_v24 = vld [vmem:[%s2026_s1 + $0x368] sm:$0xff]  ;;  %v127_v25 = vld [vmem:[%s2026_s1 + $0x378] sm:$0xff]  ;;  %v124_v26 = vld [vmem:[%s2026_s1 + $0x360] sm:$0xff] }
   0xa   :  { %241 = vmatprep.subr.mxu0 %v149_v16  ;;  %312 = vmatprep.subr.mxu1 %v151_v17  ;;  %v126_v27 = vld [vmem:[%s2026_s1 + $0x370] sm:$0xff]  ;;  %v113_v28 = vld [vmem:[%s2026_s1 + $0x308] sm:$0xff]  ;;  %v115_v29 = vld [vmem:[%s2026_s1 + $0x318] sm:$0xff] }
   0xb   :  { %242 = vmatpush1.msra.mxu0 %v148_v18  ;;  %313 = vmatpush1.msra.mxu1 %v150_v19  ;;  %v112_v30 = vld [vmem:[%s2026_s1 + $0x300] sm:$0xff]  ;;  %v114_v31 = vld [vmem:[%s2026_s1 + $0x310] sm:$0xff]  ;;  %v101_v32 = vld [vmem:[%s2026_s1 + $0x2a8] sm:$0xff] }
   0xc   :  { %243 = vmatprep.subr.mxu0 %v137_v20  ;;  %314 = vmatprep.subr.mxu1 %v139_v21  ;;  %v103_v33 = vld [vmem:[%s2026_s1 + $0x2b8] sm:$0xff]  ;;  %v100_v34 = vld [vmem:[%s2026_s1 + $0x2a0] sm:$0xff]  ;;  %v102_v35 = vld [vmem:[%s2026_s1 + $0x2b0] sm:$0xff] }
   0xd   :  { %244 = vmatpush1.msra.mxu0 %v136_v22  ;;  %315 = vmatpush1.msra.mxu1 %v138_v23  ;;  %v89_v36 = vld [vmem:[%s2026_s1 + $0x248] sm:$0xff]  ;;  %v91_v37 = vld [vmem:[%s2026_s1 + $0x258] sm:$0xff]  ;;  %v88_v38 = vld [vmem:[%s2026_s1 + $0x240] sm:$0xff] }
   0xe   :  { %245 = vmatprep.subr.mxu0 %v125_v24  ;;  %316 = vmatprep.subr.mxu1 %v127_v25  ;;  %v90_v39 = vld [vmem:[%s2026_s1 + $0x250] sm:$0xff]  ;;  %v77_v40 = vld [vmem:[%s2026_s1 + $0x1e8] sm:$0xff]  ;;  %v79_v41 = vld [vmem:[%s2026_s1 + $0x1f8] sm:$0xff] }
   0xf   :  { %246 = vmatpush1.msra.mxu0 %v124_v26  ;;  %317 = vmatpush1.msra.mxu1 %v126_v27  ;;  %v76_v42 = vld [vmem:[%s2026_s1 + $0x1e0] sm:$0xff]  ;;  %v78_v43 = vld [vmem:[%s2026_s1 + $0x1f0] sm:$0xff]  ;;  %v65_v44 = vld [vmem:[%s2026_s1 + $0x188] sm:$0xff] }
  0x10   :  { %247 = vmatprep.subr.mxu0 %v113_v28  ;;  %318 = vmatprep.subr.mxu1 %v115_v29  ;;  %v67_v45 = vld [vmem:[%s2026_s1 + $0x198] sm:$0xff]  ;;  %v64_v46 = vld [vmem:[%s2026_s1 + $0x180] sm:$0xff]  ;;  %v66_v47 = vld [vmem:[%s2026_s1 + $0x190] sm:$0xff] }
  0x11   :  { %248 = vmatpush1.msra.mxu0 %v112_v30  ;;  %319 = vmatpush1.msra.mxu1 %v114_v31  ;;  %v53_v48 = vld [vmem:[%s2026_s1 + $0x128] sm:$0xff]  ;;  %v55_v49 = vld [vmem:[%s2026_s1 + $0x138] sm:$0xff]  ;;  %v52_v50 = vld [vmem:[%s2026_s1 + $0x120] sm:$0xff] }
  0x12   :  { %249 = vmatprep.subr.mxu0 %v101_v32  ;;  %320 = vmatprep.subr.mxu1 %v103_v33  ;;  %v54_v51 = vld [vmem:[%s2026_s1 + $0x130] sm:$0xff]  ;;  %v41_v52 = vld [vmem:[%s2026_s1 + $0xc8] sm:$0xff]  ;;  %v43_v53 = vld [vmem:[%s2026_s1 + $0xd8] sm:$0xff] }
  0x13   :  { %250 = vmatpush1.msra.mxu0 %v100_v34  ;;  %321 = vmatpush1.msra.mxu1 %v102_v35  ;;  %v40_v54 = vld [vmem:[%s2026_s1 + $0xc0] sm:$0xff]  ;;  %v42_v55 = vld [vmem:[%s2026_s1 + $0xd0] sm:$0xff]  ;;  %v29_v56 = vld [vmem:[%s2026_s1 + $0x68] sm:$0xff] }
  0x14   :  { %251 = vmatprep.subr.mxu0 %v89_v36  ;;  %322 = vmatprep.subr.mxu1 %v91_v37  ;;  %v31_v57 = vld [vmem:[%s2026_s1 + $0x78] sm:$0xff]  ;;  %v28_v58 = vld [vmem:[%s2026_s1 + $0x60] sm:$0xff]  ;;  %v30_v59 = vld [vmem:[%s2026_s1 + $0x70] sm:$0xff] }
  0x15   :  { %252 = vmatpush1.msra.mxu0 %v88_v38  ;;  %323 = vmatpush1.msra.mxu1 %v90_v39  ;;  %v1338_v60 = vld.sshfl [vmem:[%s2025_s0] sm:$0x33 pattern:$0x76325410]  ;;  %v17_v61 = vld [vmem:[%s2026_s1 + $0x8] sm:$0xff]  ;;  %v19_v62 = vld [vmem:[%s2026_s1 + $0x18] sm:$0xff] }
  0x16   :  { %253 = vmatprep.subr.mxu0 %v77_v40  ;;  %324 = vmatprep.subr.mxu1 %v79_v41  ;;  %v16_v63 = vld [vmem:[%s2026_s1] sm:$0xff]  ;;  %v18_v0 = vld [vmem:[%s2026_s1 + $0x10] sm:$0xff]  ;;  %v209_v1 = vld [vmem:[%s2026_s1 + $0x608] sm:$0xff]  ;;  %v1360_v3 = vcombine.high %v1338_v60, %v1338_v60 }
  0x17   :  { %254 = vmatpush1.msra.mxu0 %v76_v42  ;;  %325 = vmatpush1.msra.mxu1 %v78_v43  ;;  %v211_v2 = vld [vmem:[%s2026_s1 + $0x618] sm:$0xff]  ;;  %v208_v4 = vld [vmem:[%s2026_s1 + $0x600] sm:$0xff]  ;;  %v210_v5 = vld [vmem:[%s2026_s1 + $0x610] sm:$0xff] }
  0x18   :  { %255 = vmatprep.subr.mxu0 %v65_v44  ;;  %326 = vmatprep.subr.mxu1 %v67_v45  ;;  %v201_v6 = vld [vmem:[%s2026_s1 + $0x5c8] sm:$0xff]  ;;  %v203_v7 = vld [vmem:[%s2026_s1 + $0x5d8] sm:$0xff]  ;;  %v200_v8 = vld [vmem:[%s2026_s1 + $0x5c0] sm:$0xff] }
  0x19   :  { %256 = vmatpush1.msra.mxu0 %v64_v46  ;;  %327 = vmatpush1.msra.mxu1 %v66_v47  ;;  %v202_v9 = vld [vmem:[%s2026_s1 + $0x5d0] sm:$0xff]  ;;  %v189_v10 = vld [vmem:[%s2026_s1 + $0x568] sm:$0xff]  ;;  %v191_v11 = vld [vmem:[%s2026_s1 + $0x578] sm:$0xff] }
  0x1a   :  { %257 = vmatprep.subr.mxu0 %v53_v48  ;;  %328 = vmatprep.subr.mxu1 %v55_v49  ;;  %v188_v12 = vld [vmem:[%s2026_s1 + $0x560] sm:$0xff]  ;;  %v190_v13 = vld [vmem:[%s2026_s1 + $0x570] sm:$0xff]  ;;  %v177_v14 = vld [vmem:[%s2026_s1 + $0x508] sm:$0xff] }
  0x1b   :  { %258 = vmatpush1.msra.mxu0 %v52_v50  ;;  %329 = vmatpush1.msra.mxu1 %v54_v51  ;;  %v179_v15 = vld [vmem:[%s2026_s1 + $0x518] sm:$0xff]  ;;  %v176_v16 = vld [vmem:[%s2026_s1 + $0x500] sm:$0xff]  ;;  %v178_v17 = vld [vmem:[%s2026_s1 + $0x510] sm:$0xff] }
  0x1c   :  { %259 = vmatprep.subr.mxu0 %v41_v52  ;;  %330 = vmatprep.subr.mxu1 %v43_v53  ;;  %v165_v18 = vld [vmem:[%s2026_s1 + $0x4a8] sm:$0xff]  ;;  %v167_v19 = vld [vmem:[%s2026_s1 + $0x4b8] sm:$0xff]  ;;  %v164_v20 = vld [vmem:[%s2026_s1 + $0x4a0] sm:$0xff] }
  0x1d   :  { %260 = vmatpush1.msra.mxu0 %v40_v54  ;;  %331 = vmatpush1.msra.mxu1 %v42_v55  ;;  %v166_v21 = vld [vmem:[%s2026_s1 + $0x4b0] sm:$0xff]  ;;  %v153_v22 = vld [vmem:[%s2026_s1 + $0x448] sm:$0xff]  ;;  %v155_v23 = vld [vmem:[%s2026_s1 + $0x458] sm:$0xff] }
  0x1e   :  { %261 = vmatprep.subr.mxu0 %v29_v56  ;;  %332 = vmatprep.subr.mxu1 %v31_v57  ;;  %v152_v24 = vld [vmem:[%s2026_s1 + $0x440] sm:$0xff]  ;;  %v154_v25 = vld [vmem:[%s2026_s1 + $0x450] sm:$0xff]  ;;  %v141_v26 = vld [vmem:[%s2026_s1 + $0x3e8] sm:$0xff] }
  0x1f   :  { %262 = vmatpush1.msra.mxu0 %v28_v58  ;;  %333 = vmatpush1.msra.mxu1 %v30_v59  ;;  %v143_v27 = vld [vmem:[%s2026_s1 + $0x3f8] sm:$0xff]  ;;  %v140_v28 = vld [vmem:[%s2026_s1 + $0x3e0] sm:$0xff]  ;;  %v142_v29 = vld [vmem:[%s2026_s1 + $0x3f0] sm:$0xff] }
  0x20   :  { %263 = vmatprep.subr.mxu0 %v17_v61  ;;  %334 = vmatprep.subr.mxu1 %v19_v62  ;;  %v129_v30 = vld [vmem:[%s2026_s1 + $0x388] sm:$0xff]  ;;  %v131_v31 = vld [vmem:[%s2026_s1 + $0x398] sm:$0xff]  ;;  %v128_v32 = vld [vmem:[%s2026_s1 + $0x380] sm:$0xff] }
  0x21   :  { %264 = vmatpush1.msra.mxu0 %v16_v63  ;;  %335 = vmatpush1.msra.mxu1 %v18_v0  ;;  %v130_v33 = vld [vmem:[%s2026_s1 + $0x390] sm:$0xff]  ;;  %v117_v34 = vld [vmem:[%s2026_s1 + $0x328] sm:$0xff]  ;;  %v119_v35 = vld [vmem:[%s2026_s1 + $0x338] sm:$0xff] }
  0x22   :  { %295 = vmatprep.subr.mxu0 %v209_v1  ;;  %366 = vmatprep.subr.mxu1 %v211_v2  ;;  %v116_v36 = vld [vmem:[%s2026_s1 + $0x320] sm:$0xff]  ;;  %v118_v37 = vld [vmem:[%s2026_s1 + $0x330] sm:$0xff]  ;;  %v105_v38 = vld [vmem:[%s2026_s1 + $0x2c8] sm:$0xff] }
  0x23   :  { %296 = vmatpush2.msra.mxu0 %v208_v4  ;;  %962 = vmatprep.mubr.msk.f32.mxu0 %vm230_vm0, %v1360_v3  ;;  %v107_v39 = vld [vmem:[%s2026_s1 + $0x2d8] sm:$0xff]  ;;  %v104_v40 = vld [vmem:[%s2026_s1 + $0x2c0] sm:$0xff]  ;;  %v106_v41 = vld [vmem:[%s2026_s1 + $0x2d0] sm:$0xff] }
  0x24   :  { %367 = vmatpush2.msra.mxu1 %v210_v5  ;;  %963 = vmatprep.mubr.msk.f32.mxu1 %vm230_vm0, %v1360_v3  ;;  %v93_v42 = vld [vmem:[%s2026_s1 + $0x268] sm:$0xff]  ;;  %v95_v43 = vld [vmem:[%s2026_s1 + $0x278] sm:$0xff]  ;;  %v92_v44 = vld [vmem:[%s2026_s1 + $0x260] sm:$0xff] }
  0x25   :  { %298 = vmatmul.mubr.f32.vlgmr.msra.gmra.mxu0 %v1338_v60  ;;  %369 = vmatmul.mubr.f32.vlgmr.msra.gmra.mxu1 %v1338_v60  ;;  %v94_v45 = vld [vmem:[%s2026_s1 + $0x270] sm:$0xff]  ;;  %v81_v46 = vld [vmem:[%s2026_s1 + $0x208] sm:$0xff]  ;;  %v83_v47 = vld [vmem:[%s2026_s1 + $0x218] sm:$0xff] }
  0x26   :  { %375 = vmatprep.subr.mxu0 %v201_v6  ;;  %446 = vmatprep.subr.mxu1 %v203_v7  ;;  %v80_v48 = vld [vmem:[%s2026_s1 + $0x200] sm:$0xff]  ;;  %v82_v49 = vld [vmem:[%s2026_s1 + $0x210] sm:$0xff]  ;;  %v69_v50 = vld [vmem:[%s2026_s1 + $0x1a8] sm:$0xff] }
  0x27   :  { %376 = vmatpush1.msra.mxu0 %v200_v8  ;;  %447 = vmatpush1.msra.mxu1 %v202_v9  ;;  %v71_v51 = vld [vmem:[%s2026_s1 + $0x1b8] sm:$0xff]  ;;  %v68_v52 = vld [vmem:[%s2026_s1 + $0x1a0] sm:$0xff]  ;;  %v70_v53 = vld [vmem:[%s2026_s1 + $0x1b0] sm:$0xff] }
  0x28   :  { %377 = vmatprep.subr.mxu0 %v189_v10  ;;  %448 = vmatprep.subr.mxu1 %v191_v11  ;;  %v57_v54 = vld [vmem:[%s2026_s1 + $0x148] sm:$0xff]  ;;  %v59_v55 = vld [vmem:[%s2026_s1 + $0x158] sm:$0xff]  ;;  %v56_v56 = vld [vmem:[%s2026_s1 + $0x140] sm:$0xff] }
  0x29   :  { %378 = vmatpush1.msra.mxu0 %v188_v12  ;;  %449 = vmatpush1.msra.mxu1 %v190_v13  ;;  %v58_v57 = vld [vmem:[%s2026_s1 + $0x150] sm:$0xff]  ;;  %v45_v58 = vld [vmem:[%s2026_s1 + $0xe8] sm:$0xff]  ;;  %v47_v59 = vld [vmem:[%s2026_s1 + $0xf8] sm:$0xff] }
  0x2a   :  { %379 = vmatprep.subr.mxu0 %v177_v14  ;;  %450 = vmatprep.subr.mxu1 %v179_v15  ;;  %v44_v61 = vld [vmem:[%s2026_s1 + $0xe0] sm:$0xff]  ;;  %v46_v62 = vld [vmem:[%s2026_s1 + $0xf0] sm:$0xff]  ;;  %v33_v63 = vld [vmem:[%s2026_s1 + $0x88] sm:$0xff] }
  0x2b   :  { %380 = vmatpush1.msra.mxu0 %v176_v16  ;;  %451 = vmatpush1.msra.mxu1 %v178_v17  ;;  %v35_v0 = vld [vmem:[%s2026_s1 + $0x98] sm:$0xff]  ;;  %v32_v1 = vld [vmem:[%s2026_s1 + $0x80] sm:$0xff]  ;;  %v34_v2 = vld [vmem:[%s2026_s1 + $0x90] sm:$0xff] }
  0x2c   :  { %381 = vmatprep.subr.mxu0 %v165_v18  ;;  %452 = vmatprep.subr.mxu1 %v167_v19  ;;  %v21_v4 = vld [vmem:[%s2026_s1 + $0x28] sm:$0xff]  ;;  %v23_v5 = vld [vmem:[%s2026_s1 + $0x38] sm:$0xff]  ;;  %v20_v6 = vld [vmem:[%s2026_s1 + $0x20] sm:$0xff] }
  0x2d   :  { %382 = vmatpush1.msra.mxu0 %v164_v20  ;;  %453 = vmatpush1.msra.mxu1 %v166_v21  ;;  %v22_v7 = vld [vmem:[%s2026_s1 + $0x30] sm:$0xff]  ;;  %v213_v8 = vld [vmem:[%s2026_s1 + $0x628] sm:$0xff]  ;;  %v215_v9 = vld [vmem:[%s2026_s1 + $0x638] sm:$0xff] }
  0x2e   :  { %383 = vmatprep.subr.mxu0 %v153_v22  ;;  %454 = vmatprep.subr.mxu1 %v155_v23  ;;  %v212_v10 = vld [vmem:[%s2026_s1 + $0x620] sm:$0xff]  ;;  %v214_v11 = vld [vmem:[%s2026_s1 + $0x630] sm:$0xff] }
  0x2f   :  { %384 = vmatpush1.msra.mxu0 %v152_v24  ;;  %455 = vmatpush1.msra.mxu1 %v154_v25 }
  0x30   :  { %385 = vmatprep.subr.mxu0 %v141_v26  ;;  %456 = vmatprep.subr.mxu1 %v143_v27 }
  0x31   :  { %386 = vmatpush1.msra.mxu0 %v140_v28  ;;  %457 = vmatpush1.msra.mxu1 %v142_v29 }
  0x32   :  { %387 = vmatprep.subr.mxu0 %v129_v30  ;;  %458 = vmatprep.subr.mxu1 %v131_v31 }
  0x33   :  { %388 = vmatpush1.msra.mxu0 %v128_v32  ;;  %459 = vmatpush1.msra.mxu1 %v130_v33 }
  0x34   :  { %389 = vmatprep.subr.mxu0 %v117_v34  ;;  %460 = vmatprep.subr.mxu1 %v119_v35 }
  0x35   :  { %390 = vmatpush1.msra.mxu0 %v116_v36  ;;  %461 = vmatpush1.msra.mxu1 %v118_v37 }
  0x36   :  { %391 = vmatprep.subr.mxu0 %v105_v38  ;;  %462 = vmatprep.subr.mxu1 %v107_v39 }
  0x37   :  { %392 = vmatpush1.msra.mxu0 %v104_v40  ;;  %463 = vmatpush1.msra.mxu1 %v106_v41 }
  0x38   :  { %393 = vmatprep.subr.mxu0 %v93_v42  ;;  %464 = vmatprep.subr.mxu1 %v95_v43 }
  0x39   :  { %394 = vmatpush1.msra.mxu0 %v92_v44  ;;  %465 = vmatpush1.msra.mxu1 %v94_v45 }
  0x3a   :  { %395 = vmatprep.subr.mxu0 %v81_v46  ;;  %466 = vmatprep.subr.mxu1 %v83_v47 }
  0x3b   :  { %396 = vmatpush1.msra.mxu0 %v80_v48  ;;  %467 = vmatpush1.msra.mxu1 %v82_v49 }
  0x3c   :  { %397 = vmatprep.subr.mxu0 %v69_v50  ;;  %468 = vmatprep.subr.mxu1 %v71_v51 }
  0x3d   :  { %398 = vmatpush1.msra.mxu0 %v68_v52  ;;  %469 = vmatpush1.msra.mxu1 %v70_v53 }
  0x3e   :  { %399 = vmatprep.subr.mxu0 %v57_v54  ;;  %470 = vmatprep.subr.mxu1 %v59_v55 }
  0x3f   :  { %400 = vmatpush1.msra.mxu0 %v56_v56  ;;  %471 = vmatpush1.msra.mxu1 %v58_v57 }
  0x40   :  { %401 = vmatprep.subr.mxu0 %v45_v58  ;;  %472 = vmatprep.subr.mxu1 %v47_v59 }
  0x41   :  { %402 = vmatpush1.msra.mxu0 %v44_v61  ;;  %473 = vmatpush1.msra.mxu1 %v46_v62 }
  0x42   :  { %403 = vmatprep.subr.mxu0 %v33_v63  ;;  %474 = vmatprep.subr.mxu1 %v35_v0 }
  0x43   :  { %404 = vmatpush1.msra.mxu0 %v32_v1  ;;  %475 = vmatpush1.msra.mxu1 %v34_v2 }
  0x44   :  { %405 = vmatprep.subr.mxu0 %v21_v4  ;;  %476 = vmatprep.subr.mxu1 %v23_v5 }
  0x45   :  { %406 = vmatpush1.msra.mxu0 %v20_v6  ;;  %477 = vmatpush1.msra.mxu1 %v22_v7 }
  0x46   :  { %8 = vsyncpa [#allocation3], 0  ;;  %437 = vmatprep.subr.mxu0 %v213_v8  ;;  %508 = vmatprep.subr.mxu1 %v215_v9  ;;  %v205_v12 = vld [vmem:[%s2026_s1 + $0x5e8] sm:$0xff]  ;;  %v207_v13 = vld [vmem:[%s2026_s1 + $0x5f8] sm:$0xff]  ;;  %vm1133_vm1 = vmmov 0   ;;  %s1134_s17 = smov [#allocation2]  }
  0x47   :  { %438 = vmatpush2.msra.mxu0 %v212_v10  ;;  %964 = vmatprep.mubr.msk.f32.mxu0 %vm230_vm0, %v1360_v3  ;;  %v204_v14 = vld [vmem:[%s2026_s1 + $0x5e0] sm:$0xff]  ;;  %v206_v15 = vld [vmem:[%s2026_s1 + $0x5f0] sm:$0xff]  ;;  %v193_v16 = vld [vmem:[%s2026_s1 + $0x588] sm:$0xff]  ;;  %s953_s18 = sshll.u32 %s1134_s17, 4  ;;  %s954_s18 = int_to_ptr.vmem [resolvable:$true] %s953_s18 }
  0x48   :  { %509 = vmatpush2.msra.mxu1 %v214_v11  ;;  %965 = vmatprep.mubr.msk.f32.mxu1 %vm230_vm0, %v1360_v3  ;;  %v195_v17 = vld [vmem:[%s2026_s1 + $0x598] sm:$0xff]  ;;  %v192_v18 = vld [vmem:[%s2026_s1 + $0x580] sm:$0xff]  ;;  %v194_v19 = vld [vmem:[%s2026_s1 + $0x590] sm:$0xff]  ;;  %s1110_s19 = scalar_lea.vmem %s954_s18, 32  ;;  %p1115_p1 = scmp.lt.s32.totalorder %s954_s18, %s954_s18 }
  0x49   :  { %440 = vmatmul.mubr.f32.vlgmr.msra.gmra.mxu0 %v1338_v60  ;;  %511 = vmatmul.mubr.f32.vlgmr.msra.gmra.mxu1 %v1338_v60  ;;  %v181_v20 = vld [vmem:[%s2026_s1 + $0x528] sm:$0xff]  ;;  %v183_v21 = vld [vmem:[%s2026_s1 + $0x538] sm:$0xff]  ;;  %v180_v22 = vld [vmem:[%s2026_s1 + $0x520] sm:$0xff]  ;;  %p1111_p0 = scmp.ne.s32.totalorder %s954_s18, %s1110_s19  ;;  %p1116_p2 = scmp.lt.s32.totalorder %s1110_s19, %s1110_s19 }
  0x4a   :  { %517 = vmatprep.subr.mxu0 %v205_v12  ;;  %588 = vmatprep.subr.mxu1 %v207_v13  ;;  %v182_v23 = vld [vmem:[%s2026_s1 + $0x530] sm:$0xff]  ;;  %v169_v24 = vld [vmem:[%s2026_s1 + $0x4c8] sm:$0xff]  ;;  %v171_v25 = vld [vmem:[%s2026_s1 + $0x4d8] sm:$0xff] }
  0x4b   :  { %518 = vmatpush1.msra.mxu0 %v204_v14  ;;  %589 = vmatpush1.msra.mxu1 %v206_v15  ;;  %v168_v26 = vld [vmem:[%s2026_s1 + $0x4c0] sm:$0xff]  ;;  %v170_v27 = vld [vmem:[%s2026_s1 + $0x4d0] sm:$0xff]  ;;  %v157_v28 = vld [vmem:[%s2026_s1 + $0x468] sm:$0xff]  ;;  %p1117_p3 = por %p1116_p2, %p1115_p1 }
  0x4c   :  { %519 = vmatprep.subr.mxu0 %v193_v16  ;;  %590 = vmatprep.subr.mxu1 %v195_v17  ;;  %v159_v29 = vld [vmem:[%s2026_s1 + $0x478] sm:$0xff]  ;;  %v156_v30 = vld [vmem:[%s2026_s1 + $0x460] sm:$0xff]  ;;  %v158_v31 = vld [vmem:[%s2026_s1 + $0x470] sm:$0xff] }
  0x4d   :  { %520 = vmatpush1.msra.mxu0 %v192_v18  ;;  %591 = vmatpush1.msra.mxu1 %v194_v19  ;;  %v145_v32 = vld [vmem:[%s2026_s1 + $0x408] sm:$0xff]  ;;  %v147_v33 = vld [vmem:[%s2026_s1 + $0x418] sm:$0xff]  ;;  %v144_v34 = vld [vmem:[%s2026_s1 + $0x400] sm:$0xff]  ;;  %p1118_p4 = pnand %p1117_p3, %p1111_p0 }
  0x4e   :  { %521 = vmatprep.subr.mxu0 %v181_v20  ;;  %592 = vmatprep.subr.mxu1 %v183_v21  ;;  %v146_v35 = vld [vmem:[%s2026_s1 + $0x410] sm:$0xff]  ;;  %v133_v36 = vld [vmem:[%s2026_s1 + $0x3a8] sm:$0xff]  ;;  %v135_v37 = vld [vmem:[%s2026_s1 + $0x3b8] sm:$0xff]  ;;  %v1132_v21 = vmov 0.0  }
  0x4f   :  { %522 = vmatpush1.msra.mxu0 %v180_v22  ;;  %593 = vmatpush1.msra.mxu1 %v182_v23  ;;  %v132_v38 = vld [vmem:[%s2026_s1 + $0x3a0] sm:$0xff]  ;;  %v134_v39 = vld [vmem:[%s2026_s1 + $0x3b0] sm:$0xff]  ;;  %v121_v40 = vld [vmem:[%s2026_s1 + $0x348] sm:$0xff] }
  0x50   :  { %523 = vmatprep.subr.mxu0 %v169_v24  ;;  %594 = vmatprep.subr.mxu1 %v171_v25  ;;  %v123_v41 = vld [vmem:[%s2026_s1 + $0x358] sm:$0xff]  ;;  %v120_v42 = vld [vmem:[%s2026_s1 + $0x340] sm:$0xff]  ;;  %v122_v43 = vld [vmem:[%s2026_s1 + $0x350] sm:$0xff] }
  0x51   :  { %524 = vmatpush1.msra.mxu0 %v168_v26  ;;  %595 = vmatpush1.msra.mxu1 %v170_v27  ;;  %v109_v44 = vld [vmem:[%s2026_s1 + $0x2e8] sm:$0xff]  ;;  %v111_v45 = vld [vmem:[%s2026_s1 + $0x2f8] sm:$0xff]  ;;  %v108_v46 = vld [vmem:[%s2026_s1 + $0x2e0] sm:$0xff] }
  0x52   :  { %525 = vmatprep.subr.mxu0 %v157_v28  ;;  %596 = vmatprep.subr.mxu1 %v159_v29  ;;  %v110_v47 = vld [vmem:[%s2026_s1 + $0x2f0] sm:$0xff]  ;;  %v97_v48 = vld [vmem:[%s2026_s1 + $0x288] sm:$0xff]  ;;  %v99_v49 = vld [vmem:[%s2026_s1 + $0x298] sm:$0xff] }
  0x53   :  { %526 = vmatpush1.msra.mxu0 %v156_v30  ;;  %597 = vmatpush1.msra.mxu1 %v158_v31  ;;  %v96_v50 = vld [vmem:[%s2026_s1 + $0x280] sm:$0xff]  ;;  %v98_v51 = vld [vmem:[%s2026_s1 + $0x290] sm:$0xff]  ;;  %v85_v52 = vld [vmem:[%s2026_s1 + $0x228] sm:$0xff] }
  0x54   :  { %527 = vmatprep.subr.mxu0 %v145_v32  ;;  %598 = vmatprep.subr.mxu1 %v147_v33  ;;  %v87_v53 = vld [vmem:[%s2026_s1 + $0x238] sm:$0xff]  ;;  %v84_v54 = vld [vmem:[%s2026_s1 + $0x220] sm:$0xff]  ;;  %v86_v55 = vld [vmem:[%s2026_s1 + $0x230] sm:$0xff] }
  0x55   :  { %528 = vmatpush1.msra.mxu0 %v144_v34  ;;  %599 = vmatpush1.msra.mxu1 %v146_v35  ;;  %v73_v56 = vld [vmem:[%s2026_s1 + $0x1c8] sm:$0xff]  ;;  %v75_v57 = vld [vmem:[%s2026_s1 + $0x1d8] sm:$0xff]  ;;  %v72_v58 = vld [vmem:[%s2026_s1 + $0x1c0] sm:$0xff] }
  0x56   :  { %529 = vmatprep.subr.mxu0 %v133_v36  ;;  %600 = vmatprep.subr.mxu1 %v135_v37  ;;  %v74_v59 = vld [vmem:[%s2026_s1 + $0x1d0] sm:$0xff]  ;;  %v61_v61 = vld [vmem:[%s2026_s1 + $0x168] sm:$0xff]  ;;  %v63_v62 = vld [vmem:[%s2026_s1 + $0x178] sm:$0xff] }
  0x57   :  { %530 = vmatpush1.msra.mxu0 %v132_v38  ;;  %601 = vmatpush1.msra.mxu1 %v134_v39  ;;  %v60_v63 = vld [vmem:[%s2026_s1 + $0x160] sm:$0xff]  ;;  %v62_v0 = vld [vmem:[%s2026_s1 + $0x170] sm:$0xff]  ;;  %v49_v1 = vld [vmem:[%s2026_s1 + $0x108] sm:$0xff] }
  0x58   :  { %531 = vmatprep.subr.mxu0 %v121_v40  ;;  %602 = vmatprep.subr.mxu1 %v123_v41  ;;  %v51_v2 = vld [vmem:[%s2026_s1 + $0x118] sm:$0xff]  ;;  %v48_v4 = vld [vmem:[%s2026_s1 + $0x100] sm:$0xff]  ;;  %v50_v5 = vld [vmem:[%s2026_s1 + $0x110] sm:$0xff] }
  0x59   :  { %532 = vmatpush1.msra.mxu0 %v120_v42  ;;  %603 = vmatpush1.msra.mxu1 %v122_v43  ;;  %v37_v6 = vld [vmem:[%s2026_s1 + $0xa8] sm:$0xff]  ;;  %v39_v7 = vld [vmem:[%s2026_s1 + $0xb8] sm:$0xff]  ;;  %v36_v8 = vld [vmem:[%s2026_s1 + $0xa0] sm:$0xff] }
  0x5a   :  { %533 = vmatprep.subr.mxu0 %v109_v44  ;;  %604 = vmatprep.subr.mxu1 %v111_v45  ;;  %v38_v9 = vld [vmem:[%s2026_s1 + $0xb0] sm:$0xff]  ;;  %v25_v10 = vld [vmem:[%s2026_s1 + $0x48] sm:$0xff]  ;;  %v27_v11 = vld [vmem:[%s2026_s1 + $0x58] sm:$0xff] }
  0x5b   :  { %534 = vmatpush1.msra.mxu0 %v108_v46  ;;  %605 = vmatpush1.msra.mxu1 %v110_v47  ;;  %v24_v12 = vld [vmem:[%s2026_s1 + $0x40] sm:$0xff]  ;;  %v26_v13 = vld [vmem:[%s2026_s1 + $0x50] sm:$0xff]  ;;  %v217_v14 = vld [vmem:[%s2026_s1 + $0x648] sm:$0xff] }
  0x5c   :  { %535 = vmatprep.subr.mxu0 %v97_v48  ;;  %606 = vmatprep.subr.mxu1 %v99_v49  ;;  %v219_v15 = vld [vmem:[%s2026_s1 + $0x658] sm:$0xff]  ;;  %v216_v16 = vld [vmem:[%s2026_s1 + $0x640] sm:$0xff]  ;;  %v218_v17 = vld [vmem:[%s2026_s1 + $0x650] sm:$0xff] }
  0x5d   :  { %536 = vmatpush1.msra.mxu0 %v96_v50  ;;  %607 = vmatpush1.msra.mxu1 %v98_v51  ;;  %v702_v18 = vld [vmem:[%s2027_s2 + $0xf8] sm:$0xff]  ;;  %v717_v22 = vld [vmem:[%s2027_s2 + $0x170] sm:$0xff]  ;;  %v700_v23 = vld [vmem:[%s2027_s2 + $0xe8] sm:$0xff] }
  0x5e   :  { %537 = vmatprep.subr.mxu0 %v85_v52  ;;  %608 = vmatprep.subr.mxu1 %v87_v53  ;;  %v686_v19 = vld [vmem:[%s2027_s2 + $0x78] sm:$0xff]  ;;  %v684_v24 = vld [vmem:[%s2027_s2 + $0x68] sm:$0xff]  ;;  %v699_v26 = vld [vmem:[%s2027_s2 + $0xe0] sm:$0xff] }
  0x5f   :  { %538 = vmatpush1.msra.mxu0 %v84_v54  ;;  %609 = vmatpush1.msra.mxu1 %v86_v55  ;;  %v718_v20 = vld [vmem:[%s2027_s2 + $0x178] sm:$0xff]  ;;  %v716_v25 = vld [vmem:[%s2027_s2 + $0x168] sm:$0xff]  ;;  %v683_v27 = vld [vmem:[%s2027_s2 + $0x60] sm:$0xff] }
  0x60   :  { %539 = vmatprep.subr.mxu0 %v73_v56  ;;  %610 = vmatprep.subr.mxu1 %v75_v57  ;;  %v715_v28 = vld [vmem:[%s2027_s2 + $0x160] sm:$0xff]  ;;  %v698_v29 = vld [vmem:[%s2027_s2 + $0xd8] sm:$0xff]  ;;  %v697_v32 = vld [vmem:[%s2027_s2 + $0xd0] sm:$0xff] }
  0x61   :  { %540 = vmatpush1.msra.mxu0 %v72_v58  ;;  %611 = vmatpush1.msra.mxu1 %v74_v59  ;;  %v682_v30 = vld [vmem:[%s2027_s2 + $0x58] sm:$0xff]  ;;  %v681_v33 = vld [vmem:[%s2027_s2 + $0x50] sm:$0xff]  ;;  %v696_v35 = vld [vmem:[%s2027_s2 + $0xc8] sm:$0xff] }
  0x62   :  { %541 = vmatprep.subr.mxu0 %v61_v61  ;;  %612 = vmatprep.subr.mxu1 %v63_v62  ;;  %v714_v31 = vld [vmem:[%s2027_s2 + $0x158] sm:$0xff]  ;;  %v713_v34 = vld [vmem:[%s2027_s2 + $0x150] sm:$0xff]  ;;  %v680_v36 = vld [vmem:[%s2027_s2 + $0x48] sm:$0xff] }
  0x63   :  { %542 = vmatpush1.msra.mxu0 %v60_v63  ;;  %613 = vmatpush1.msra.mxu1 %v62_v0  ;;  %v712_v37 = vld [vmem:[%s2027_s2 + $0x148] sm:$0xff]  ;;  %v695_v38 = vld [vmem:[%s2027_s2 + $0xc0] sm:$0xff]  ;;  %v694_v41 = vld [vmem:[%s2027_s2 + $0xb8] sm:$0xff] }
  0x64   :  { %543 = vmatprep.subr.mxu0 %v49_v1  ;;  %614 = vmatprep.subr.mxu1 %v51_v2  ;;  %v679_v39 = vld [vmem:[%s2027_s2 + $0x40] sm:$0xff]  ;;  %v678_v42 = vld [vmem:[%s2027_s2 + $0x38] sm:$0xff]  ;;  %v693_v44 = vld [vmem:[%s2027_s2 + $0xb0] sm:$0xff] }
  0x65   :  { %544 = vmatpush1.msra.mxu0 %v48_v4  ;;  %615 = vmatpush1.msra.mxu1 %v50_v5  ;;  %v711_v40 = vld [vmem:[%s2027_s2 + $0x140] sm:$0xff]  ;;  %v710_v43 = vld [vmem:[%s2027_s2 + $0x138] sm:$0xff]  ;;  %v677_v45 = vld [vmem:[%s2027_s2 + $0x30] sm:$0xff] }
  0x66   :  { %545 = vmatprep.subr.mxu0 %v37_v6  ;;  %616 = vmatprep.subr.mxu1 %v39_v7  ;;  %v709_v46 = vld [vmem:[%s2027_s2 + $0x130] sm:$0xff]  ;;  %v692_v47 = vld [vmem:[%s2027_s2 + $0xa8] sm:$0xff]  ;;  %v691_v50 = vld [vmem:[%s2027_s2 + $0xa0] sm:$0xff] }
  0x67   :  { %546 = vmatpush1.msra.mxu0 %v36_v8  ;;  %617 = vmatpush1.msra.mxu1 %v38_v9  ;;  %v676_v48 = vld [vmem:[%s2027_s2 + $0x28] sm:$0xff]  ;;  %v675_v51 = vld [vmem:[%s2027_s2 + $0x20] sm:$0xff]  ;;  %v690_v53 = vld [vmem:[%s2027_s2 + $0x98] sm:$0xff] }
  0x68   :  { %547 = vmatprep.subr.mxu0 %v25_v10  ;;  %618 = vmatprep.subr.mxu1 %v27_v11  ;;  %v708_v49 = vld [vmem:[%s2027_s2 + $0x128] sm:$0xff]  ;;  %v707_v52 = vld [vmem:[%s2027_s2 + $0x120] sm:$0xff]  ;;  %v674_v54 = vld [vmem:[%s2027_s2 + $0x18] sm:$0xff] }
  0x69   :  { %548 = vmatpush1.msra.mxu0 %v24_v12  ;;  %619 = vmatpush1.msra.mxu1 %v26_v13  ;;  %v706_v55 = vld [vmem:[%s2027_s2 + $0x118] sm:$0xff]  ;;  %v689_v56 = vld [vmem:[%s2027_s2 + $0x90] sm:$0xff]  ;;  %v688_v59 = vld [vmem:[%s2027_s2 + $0x88] sm:$0xff] }
  0x6a   :  { %579 = vmatprep.subr.mxu0 %v217_v14  ;;  %650 = vmatprep.subr.mxu1 %v219_v15  ;;  %v673_v57 = vld [vmem:[%s2027_s2 + $0x10] sm:$0xff]  ;;  %v672_v61 = vld [vmem:[%s2027_s2 + $0x8] sm:$0xff]  ;;  %v687_v63 = vld [vmem:[%s2027_s2 + $0x80] sm:$0xff] }
  0x6b   :  { %580 = vmatpush2.msra.mxu0 %v216_v16  ;;  %966 = vmatprep.mubr.msk.f32.mxu0 %vm230_vm0, %v1360_v3  ;;  %v705_v58 = vld [vmem:[%s2027_s2 + $0x110] sm:$0xff]  ;;  %v704_v62 = vld [vmem:[%s2027_s2 + $0x108] sm:$0xff]  ;;  %v671_v0 = vld [vmem:[%s2027_s2] sm:$0xff] }
  0x6c   :  { %651 = vmatpush2.msra.mxu1 %v218_v17  ;;  %967 = vmatprep.mubr.msk.f32.mxu1 %vm230_vm0, %v1360_v3  ;;  %v685_v3 = vld [vmem:[%s2027_s2 + $0x70] sm:$0xff]  ;;  %v703_v1 = vld [vmem:[%s2027_s2 + $0x100] sm:$0xff] }
  0x6d   :  { %582 = vmatmul.mubr.f32.vlgmr.msra.gmra.mxu0 %v1338_v60  ;;  %653 = vmatmul.mubr.f32.vlgmr.msra.gmra.mxu1 %v1338_v60  ;;  %v701_v60 = vld [vmem:[%s2027_s2 + $0xf0] sm:$0xff] }
  0x6e   :  { %968 = vmatprep.subr.mxu0 %v702_v18  ;;  %1037 = vmatprep.subr.mxu1 %v1132_v21 }
  0x6f   :  { %969 = vmatpush3.msra.mxu0 %v686_v19  ;;  %1038 = vmatpush3.msra.mxu1 %v718_v20 }
  0x70   :  { %970 = vmatprep.subr.mxu0 %v701_v60  ;;  %1039 = vmatprep.subr.mxu1 %v1132_v21 }
  0x71   :  { %971 = vmatpush3.msra.mxu0 %v685_v3  ;;  %1040 = vmatpush3.msra.mxu1 %v717_v22 }
  0x72   :  { %972 = vmatprep.subr.mxu0 %v700_v23  ;;  %1041 = vmatprep.subr.mxu1 %v1132_v21 }
  0x73   :  { %973 = vmatpush3.msra.mxu0 %v684_v24  ;;  %1042 = vmatpush3.msra.mxu1 %v716_v25 }
  0x74   :  { %974 = vmatprep.subr.mxu0 %v699_v26  ;;  %1043 = vmatprep.subr.mxu1 %v1132_v21  ;;  %v875_v26 = vld [vmem:[%s2027_s2 + $0x1f8] sm:$0xff] }
  0x75   :  { %975 = vmatpush3.msra.mxu0 %v683_v27  ;;  %1044 = vmatpush3.msra.mxu1 %v715_v28  ;;  %v874_v27 = vld [vmem:[%s2027_s2 + $0x1f0] sm:$0xff]  ;;  %v873_v28 = vld [vmem:[%s2027_s2 + $0x1e8] sm:$0xff] }
  0x76   :  { %976 = vmatprep.subr.mxu0 %v698_v29  ;;  %1045 = vmatprep.subr.mxu1 %v1132_v21  ;;  %v872_v29 = vld [vmem:[%s2027_s2 + $0x1e0] sm:$0xff] }
  0x77   :  { %977 = vmatpush3.msra.mxu0 %v682_v30  ;;  %1046 = vmatpush3.msra.mxu1 %v714_v31  ;;  %v871_v30 = vld [vmem:[%s2027_s2 + $0x1d8] sm:$0xff]  ;;  %v870_v31 = vld [vmem:[%s2027_s2 + $0x1d0] sm:$0xff] }
  0x78   :  { %978 = vmatprep.subr.mxu0 %v697_v32  ;;  %1047 = vmatprep.subr.mxu1 %v1132_v21  ;;  %v869_v32 = vld [vmem:[%s2027_s2 + $0x1c8] sm:$0xff] }
  0x79   :  { %979 = vmatpush3.msra.mxu0 %v681_v33  ;;  %1048 = vmatpush3.msra.mxu1 %v713_v34  ;;  %v868_v33 = vld [vmem:[%s2027_s2 + $0x1c0] sm:$0xff]  ;;  %v867_v34 = vld [vmem:[%s2027_s2 + $0x1b8] sm:$0xff] }
  0x7a   :  { %980 = vmatprep.subr.mxu0 %v696_v35  ;;  %1049 = vmatprep.subr.mxu1 %v1132_v21  ;;  %v866_v35 = vld [vmem:[%s2027_s2 + $0x1b0] sm:$0xff] }
  0x7b   :  { %981 = vmatpush3.msra.mxu0 %v680_v36  ;;  %1050 = vmatpush3.msra.mxu1 %v712_v37  ;;  %v865_v36 = vld [vmem:[%s2027_s2 + $0x1a8] sm:$0xff]  ;;  %v864_v37 = vld [vmem:[%s2027_s2 + $0x1a0] sm:$0xff] }
  0x7c   :  { %982 = vmatprep.subr.mxu0 %v695_v38  ;;  %1051 = vmatprep.subr.mxu1 %v1132_v21  ;;  %v863_v38 = vld [vmem:[%s2027_s2 + $0x198] sm:$0xff] }
  0x7d   :  { %983 = vmatpush3.msra.mxu0 %v679_v39  ;;  %1052 = vmatpush3.msra.mxu1 %v711_v40  ;;  %v862_v39 = vld [vmem:[%s2027_s2 + $0x190] sm:$0xff]  ;;  %v861_v40 = vld [vmem:[%s2027_s2 + $0x188] sm:$0xff] }
  0x7e   :  { %984 = vmatprep.subr.mxu0 %v694_v41  ;;  %1053 = vmatprep.subr.mxu1 %v1132_v21  ;;  %v860_v41 = vld [vmem:[%s2027_s2 + $0x180] sm:$0xff] }
  0x7f   :  { %985 = vmatpush3.msra.mxu0 %v678_v42  ;;  %1054 = vmatpush3.msra.mxu1 %v710_v43 }
  0x80   :  { %986 = vmatprep.subr.mxu0 %v693_v44  ;;  %1055 = vmatprep.subr.mxu1 %v1132_v21 }
  0x81   :  { %987 = vmatpush3.msra.mxu0 %v677_v45  ;;  %1056 = vmatpush3.msra.mxu1 %v709_v46 }
  0x82   :  { %988 = vmatprep.subr.mxu0 %v692_v47  ;;  %1057 = vmatprep.subr.mxu1 %v1132_v21 }
  0x83   :  { %989 = vmatpush3.msra.mxu0 %v676_v48  ;;  %1058 = vmatpush3.msra.mxu1 %v708_v49 }
  0x84   :  { %990 = vmatprep.subr.mxu0 %v691_v50  ;;  %1059 = vmatprep.subr.mxu1 %v1132_v21 }
  0x85   :  { %991 = vmatpush3.msra.mxu0 %v675_v51  ;;  %1060 = vmatpush3.msra.mxu1 %v707_v52 }
  0x86   :  { %992 = vmatprep.subr.mxu0 %v690_v53  ;;  %1061 = vmatprep.subr.mxu1 %v1132_v21 }
  0x87   :  { %993 = vmatpush3.msra.mxu0 %v674_v54  ;;  %1062 = vmatpush3.msra.mxu1 %v706_v55 }
  0x88   :  { %994 = vmatprep.subr.mxu0 %v689_v56  ;;  %1063 = vmatprep.subr.mxu1 %v1132_v21 }
  0x89   :  { %995 = vmatpush3.msra.mxu0 %v673_v57  ;;  %1064 = vmatpush3.msra.mxu1 %v705_v58 }
  0x8a   :  { %996 = vmatprep.subr.mxu0 %v688_v59  ;;  %1065 = vmatprep.subr.mxu1 %v1132_v21 }
  0x8b   :  { %997 = vmatpush3.msra.mxu0 %v672_v61  ;;  %1066 = vmatpush3.msra.mxu1 %v704_v62 }
  0x8c   :  { %998 = vmatprep.subr.mxu0 %v687_v63  ;;  %1067 = vmatprep.subr.mxu1 %v1132_v21 }
  0x8d   :  { %999 = vmatpush3.msra.mxu0 %v671_v0  ;;  %1068 = vmatpush3.msra.mxu1 %v703_v1 }
  0x8e   :  { %1069 = vmatprep.mubr.msk.f32.mxu1 %vm1133_vm1, %v1132_v21  ;;  %1072 = vmatprep.subr.mxu0 %v1132_v21 }
  0xe5   :  { %v299_v2 = vpop.f32.mrf.mxu0  ;;  %v370_v4 = vpop.f32.mrf.mxu1 }
  0xe7   :  { %v301_v5 = vpop.f32.mrf.mxu0  ;;  %v372_v6 = vpop.f32.mrf.mxu1 }
  0xe8   :  { %v659_v15 = vmax.f32 %v299_v2, %v372_v6 }
 0x109   :  { %v441_v7 = vpop.f32.mrf.mxu0  ;;  %v512_v8 = vpop.f32.mrf.mxu1 }
 0x10a   :  { %v660_v13 = vmax.f32 %v301_v5, %v441_v7 }
 0x10b   :  { %v443_v9 = vpop.f32.mrf.mxu0  ;;  %v514_v10 = vpop.f32.mrf.mxu1 }
 0x10c   :  { %v661_v18 = vmax.f32 %v370_v4, %v443_v9 }
 0x12d   :  { %v583_v11 = vpop.f32.mrf.mxu0  ;;  %v654_v12 = vpop.f32.mrf.mxu1 }
 0x12e   :  { %v663_v14 = vmax.f32 %v514_v10, %v654_v12 }
 0x12f   :  { %v585_v16 = vpop.f32.mrf.mxu0  ;;  %v656_v17 = vpop.f32.mrf.mxu1 }
 0x130   :  { %v666_v19 = vmax.f32 %v660_v13, %v663_v14  ;;  %v662_v20 = vmax.f32 %v512_v8, %v585_v16  ;;  %v664_v60 = vmax.f32 %v583_v11, %v656_v17 }
 0x132   :  { %v669_v3 = vmax.f32 %v666_v19, 0.0  ;;  %v665_v22 = vmax.f32 %v659_v15, %v662_v20  ;;  %v667_v23 = vmax.f32 %v661_v18, %v664_v60 }
 0x134   :  { %v668_v24 = vmax.f32 %v665_v22, 0.0  ;;  %v670_v25 = vmax.f32 %v667_v23, 0.0  ;;  %783 = vmatprep.mubr.f32.mxu0 %v669_v3 }
 0x136   :  { %784 = vmatmul.mubr.f32.vlgmr.msra.gmra.mxu0 %v668_v24  ;;  %1070 = vmatmul.mubr.f32.vlgmr.msra.gmra.mxu1 %v670_v25 }
 0x137   :  { %1073 = vmatpush3.msra.mxu0 %v875_v26  ;;  %1104 = vmatprep.mubr.msk.f32.mxu0 %vm1133_vm1, %v1132_v21 }
 0x138   :  { %1074 = vmatprep.subr.mxu0 %v1132_v21 }
 0x139   :  { %1075 = vmatpush3.msra.mxu0 %v874_v27 }
 0x13a   :  { %1076 = vmatprep.subr.mxu0 %v1132_v21 }
 0x13b   :  { %1077 = vmatpush3.msra.mxu0 %v873_v28 }
 0x13c   :  { %1078 = vmatprep.subr.mxu0 %v1132_v21 }
 0x13d   :  { %1079 = vmatpush3.msra.mxu0 %v872_v29 }
 0x13e   :  { %1080 = vmatprep.subr.mxu0 %v1132_v21 }
 0x13f   :  { %1081 = vmatpush3.msra.mxu0 %v871_v30 }
 0x140   :  { %1082 = vmatprep.subr.mxu0 %v1132_v21 }
 0x141   :  { %1083 = vmatpush3.msra.mxu0 %v870_v31 }
 0x142   :  { %1084 = vmatprep.subr.mxu0 %v1132_v21 }
 0x143   :  { %1085 = vmatpush3.msra.mxu0 %v869_v32 }
 0x144   :  { %1086 = vmatprep.subr.mxu0 %v1132_v21 }
 0x145   :  { %1087 = vmatpush3.msra.mxu0 %v868_v33 }
 0x146   :  { %1088 = vmatprep.subr.mxu0 %v1132_v21 }
 0x147   :  { %1089 = vmatpush3.msra.mxu0 %v867_v34 }
 0x148   :  { %1090 = vmatprep.subr.mxu0 %v1132_v21 }
 0x149   :  { %1091 = vmatpush3.msra.mxu0 %v866_v35 }
 0x14a   :  { %1092 = vmatprep.subr.mxu0 %v1132_v21 }
 0x14b   :  { %1093 = vmatpush3.msra.mxu0 %v865_v36 }
 0x14c   :  { %1094 = vmatprep.subr.mxu0 %v1132_v21 }
 0x14d   :  { %1095 = vmatpush3.msra.mxu0 %v864_v37 }
 0x14e   :  { %1096 = vmatprep.subr.mxu0 %v1132_v21 }
 0x14f   :  { %1097 = vmatpush3.msra.mxu0 %v863_v38 }
 0x150   :  { %1098 = vmatprep.subr.mxu0 %v1132_v21 }
 0x151   :  { %1099 = vmatpush3.msra.mxu0 %v862_v39 }
 0x152   :  { %1100 = vmatprep.subr.mxu0 %v1132_v21 }
 0x153   :  { %1101 = vmatpush3.msra.mxu0 %v861_v40 }
 0x154   :  { %1102 = vmatprep.subr.mxu0 %v1132_v21 }
 0x155   :  { %1103 = vmatpush3.msra.mxu0 %v860_v41 }
 0x1f6   :  { %v1000_v42 = vpop.f32.mrf.mxu0  ;;  %v855_v43 = vpop.f32.mrf.mxu1 }
 0x1f8   :  { %v1001_v44 = vpop.f32.mrf.mxu0  ;;  %v1071_v45 = vpop.f32.mrf.mxu1 }
 0x1f9   :  { %v1002_v46 = vadd.f32 %v1001_v44, %v1000_v42 }
 0x1fb   :  { %v856_v47 = vadd.f32 %v1002_v46, %v855_v43 }
 0x1fd   :  { %v859_v48 = vmax.f32 %v856_v47, 0.0 }
 0x1ff   :  { %1105 = vmatmul.mubr.f32.vlgmr.msra.gmra.mxu0 %v859_v48 }
 0x2bf   :  { %v942_v49 = vpop.f32.mrf.mxu0 }
 0x2c0   :  { %946 = vst [vmem:[#allocation2] sm:$0x3] %v942_v49 }
 0x2c1   :  { %v1106_v50 = vpop.f32.mrf.mxu0 }
 0x2c2   :  { %1121 = shalt.err (!%p1118_p4)
}
 0x2c3   :  { %956 = dma.vmem_to_hbm [thread:$0]  %s954_s18, 32, %s2028_s3, [#allocation3]  }
 0x2c4   :  { %1130 = dma.done.wait [#allocation3], 32  }
 0x2c5   :  { %1131 = vsyncadd [#allocation3], 4294967264 }
 0x2c6   :  { %960 = vsyncpa [#allocation3], 1 }

</bundles_post_ra>
